<compile_context>
chip_gen: v6e
topology: v6e:2x2x1
jax: 0.10.0
libtpu: 0.0.40
codegen_flags: <defaults>
</compile_context>

<pallas_src>
import jax
import jax.numpy as jnp
from jax.experimental import pallas as pl
from jax.experimental.pallas import tpu as pltpu


LANE = 128
SUBLANE = 8


def _round_up(n: int, m: int) -> int:
    return ((n + m - 1) // m) * m


def _actor_kernel(x_ref, w1_ref, b1_ref, w2_ref, b2_ref, w3_ref, b3_ref, o_ref):
    # MXU operands use the weight dtype (f32 or bf16); accumulation is f32.
    wdt = w1_ref.dtype

    # Per-tile cast of x (hidden under MXU/DMA slots; avoids a wrapper-side
    # extra HBM pass over the batch).
    x = x_ref[...].astype(wdt)                                   # [sd, TB]

    # fc1 + bias + ReLU   (f32 epilogue: v5e has no bf16 VPU/EUP)
    h1 = jnp.dot(w1_ref[...], x, preferred_element_type=jnp.float32)
    h1 = jnp.maximum(h1 + b1_ref[...], 0.0)                      # [f1, TB]

    # fc2 + bias + ReLU
    h2 = jnp.dot(w2_ref[...], h1.astype(wdt), preferred_element_type=jnp.float32)
    h2 = jnp.maximum(h2 + b2_ref[...], 0.0)                      # [f2, TB]

    # fc_mu + bias + tanh  -> lane-dense [ap, TB] store (ap = action_dim
    # rounded up to 8 sublanes only)
    mu = jnp.dot(w3_ref[...], h2.astype(wdt), preferred_element_type=jnp.float32)
    o_ref[...] = jnp.tanh(mu + b3_ref[...]).astype(o_ref.dtype)


def actor_forward(state, params, *, block_batch=4096, use_bf16_mxu=True):
    """Fused 3-layer MLP: tanh(relu(relu(W1@x+b1) ... )) in feature-major layout.

    state : [B, state_dim] f32
    params: (w1 [f1,sd], b1 [f1,1], w2 [f2,f1], b2 [f2,1], w3 [ad,f2], b3 [ad,1])
            (PyTorch nn.Linear weight layout, biases as column vectors)
    returns [B, action_dim] f32
    """
    w1, b1, w2, b2, w3, b3 = params
    B, state_dim = state.shape
    fc1 = w1.shape[0]
    fc2 = w2.shape[0]
    action_dim = w3.shape[0]

    # ---- output: pad action_dim up to 8 sublanes (2x, not 32x lanes) ----
    ap = _round_up(action_dim, SUBLANE)
    w3p = jnp.pad(w3, ((0, ap - action_dim), (0, 0)))
    b3p = jnp.pad(b3, ((0, ap - action_dim), (0, 0)))

    # ---- batch tiling: batch sits on the lane axis, so tiles are multiples of
    #      128.  Balance the tiles (minimal batch padding) and force >= 2 tiles
    #      when the batch allows it so v7x's 2 TensorCores both get work.
    #      Per-tile VMEM footprint at TB=4096 is well under 1 MiB, so this is
    #      comfortably inside the 32 MiB scoped-VMEM default on every gen. ----
    Bp0 = _round_up(B, LANE)
    n_tiles = max(pl.cdiv(Bp0, block_batch), 2 if Bp0 >= 2 * LANE else 1)
    TB = _round_up(pl.cdiv(Bp0, n_tiles), LANE)
    Bp = _round_up(B, TB)

    # Feature-major activations: x is [state_dim, Bp], batch dense on lanes.
    xT = jnp.pad(state.T, ((0, 0), (0, Bp - B)))

    # ---- bf16 MXU operands (all generations); biases / epilogue stay f32.
    #      Note: the x cast happens inside the kernel, per tile. ----
    if use_bf16_mxu:
        w1c = w1.astype(jnp.bfloat16)
        w2c = w2.astype(jnp.bfloat16)
        w3c = w3p.astype(jnp.bfloat16)
    else:
        w1c, w2c, w3c = w1, w2, w3p

    grid = (Bp // TB,)

    # Advisory cost estimate reflecting the actual (padded) transfer sizes.
    wbytes = jnp.dtype(w1c.dtype).itemsize
    flops = 2 * Bp * (state_dim * fc1 + fc1 * fc2 + fc2 * ap)
    transcendentals = Bp * ap  # tanh
    bytes_accessed = (
        4 * Bp * state_dim                      # x read (f32)
        + 4 * Bp * ap                           # out write (f32)
        + wbytes * (state_dim * fc1 + fc1 * fc2 + fc2 * ap)
        + 4 * (fc1 + fc2 + ap)                  # biases (f32)
    )

    out = pl.pallas_call(
        _actor_kernel,
        out_shape=jax.ShapeDtypeStruct((ap, Bp), jnp.float32),
        grid=grid,
        in_specs=[
            # x: tiled over batch (lane axis)
            pl.BlockSpec((state_dim, TB), lambda i: (0, i)),
            # weights / biases: VMEM-resident across all grid steps
            pl.BlockSpec((fc1, state_dim), lambda i: (0, 0)),
            pl.BlockSpec((fc1, 1), lambda i: (0, 0)),
            pl.BlockSpec((fc2, fc1), lambda i: (0, 0)),
            pl.BlockSpec((fc2, 1), lambda i: (0, 0)),
            pl.BlockSpec((ap, fc2), lambda i: (0, 0)),
            pl.BlockSpec((ap, 1), lambda i: (0, 0)),
        ],
        out_specs=pl.BlockSpec((ap, TB), lambda i: (0, i)),
        compiler_params=pltpu.CompilerParams(
            dimension_semantics=("parallel",),  # batch tiles shard over 2 TCs on v7x
        ),
        cost_estimate=pl.CostEstimate(
            flops=flops,
            transcendentals=transcendentals,
            bytes_accessed=bytes_accessed,
        ),
    )(xT, w1c, b1, w2c, b2, w3c, b3p)

    # Slice back to logical dims and return the conventional [B, action_dim].
    return out[:action_dim, :B].T


def init_linear(key, fan_in, fan_out):
    """Init mimicking torch.nn.Linear defaults:
    weight, bias ~ U(-1/sqrt(fan_in), 1/sqrt(fan_in)).
    Weight returned in PyTorch layout [fan_out, fan_in]; bias as [fan_out, 1]."""
    kw, kb = jax.random.split(key)
    bound = 1.0 / jnp.sqrt(jnp.float32(fan_in))
    w = jax.random.uniform(kw, (fan_out, fan_in), jnp.float32, -bound, bound)
    b = jax.random.uniform(kb, (fan_out, 1), jnp.float32, -bound, bound)
    return w, b


if __name__ == "__main__":
    # Small shapes implied by the module: state_dims=(8,), fc1=32, fc2=32, action_dims=(4,)
    batch = 2
    state_dim = 8
    fc1_size = 32
    fc2_size = 32
    action_dim = 4

    key = jax.random.PRNGKey(0)
    k_x, k1, k2, k3 = jax.random.split(key, 4)

    state = jax.random.normal(k_x, (batch, state_dim), dtype=jnp.float32)
    w1, b1 = init_linear(k1, state_dim, fc1_size)
    w2, b2 = init_linear(k2, fc1_size, fc2_size)
    w3, b3 = init_linear(k3, fc2_size, action_dim)
    params = (w1, b1, w2, b2, w3, b3)

    # Reference in plain JAX (same math, same params; PyTorch-layout weights).
    ref = jnp.tanh(
        jnp.maximum(jnp.maximum(state @ w1.T + b1.T, 0.0) @ w2.T + b2.T, 0.0)
        @ w3.T + b3.T
    )

    # f32 MXU path: exact-tolerance check against the reference.
    out_f32 = jax.block_until_ready(actor_forward(state, params, use_bf16_mxu=False))
    assert out_f32.shape == (batch, action_dim)
    assert jnp.allclose(out_f32, ref, atol=1e-5, rtol=1e-5)

    # bf16 MXU operands (recommended default on v5e/v6e/v7x): loosened tolerance,
    # since h1/h2 are re-cast to bf16 between layers.
    out_bf16 = jax.block_until_ready(actor_forward(state, params, use_bf16_mxu=True))
    assert out_bf16.shape == (batch, action_dim)
    assert jnp.allclose(out_bf16, ref, atol=3e-2, rtol=3e-2)

    print("KERNEL_OK")
</pallas_src>

<mosaic_0001>
module attributes {stable_mosaic.version = 11 : i64} {
  func.func @_actor_kernel(%arg0: i32, %arg1: memref<8x128xf32, #tpu.memory_space<vmem>>, %arg2: memref<32x8xf32, #tpu.memory_space<vmem>>, %arg3: memref<32x1xf32, #tpu.memory_space<vmem>>, %arg4: memref<32x32xf32, #tpu.memory_space<vmem>>, %arg5: memref<32x1xf32, #tpu.memory_space<vmem>>, %arg6: memref<8x32xf32, #tpu.memory_space<vmem>>, %arg7: memref<8x1xf32, #tpu.memory_space<vmem>>, %arg8: memref<8x128xf32, #tpu.memory_space<vmem>>) attributes {dimension_semantics = [#tpu.dimension_semantics<parallel>], iteration_bounds = array<i64: 1>, scalar_prefetch = 0 : i64, scratch_operands = 0 : i64, tpu.core_type = #tpu.core_type<tc>, window_params = [{transform_indices = @transform_0, window_bounds = array<i64: 8, 128>}, {pipeline_mode = #tpu.pipeline_mode<synchronous>, transform_indices = @transform_1, window_bounds = array<i64: 32, 8>}, {pipeline_mode = #tpu.pipeline_mode<synchronous>, transform_indices = @transform_2, window_bounds = array<i64: 32, 1>}, {pipeline_mode = #tpu.pipeline_mode<synchronous>, transform_indices = @transform_3, window_bounds = array<i64: 32, 32>}, {pipeline_mode = #tpu.pipeline_mode<synchronous>, transform_indices = @transform_4, window_bounds = array<i64: 32, 1>}, {pipeline_mode = #tpu.pipeline_mode<synchronous>, transform_indices = @transform_5, window_bounds = array<i64: 8, 32>}, {pipeline_mode = #tpu.pipeline_mode<synchronous>, transform_indices = @transform_6, window_bounds = array<i64: 8, 1>}, {transform_indices = @transform_7, window_bounds = array<i64: 8, 128>}]} {
    %c0 = arith.constant 0 : index
    %c0_0 = arith.constant 0 : index
    %0 = vector.load %arg1[%c0, %c0_0] : memref<8x128xf32, #tpu.memory_space<vmem>>, vector<8x128xf32>
    %c0_1 = arith.constant 0 : index
    %c0_2 = arith.constant 0 : index
    %1 = vector.load %arg2[%c0_1, %c0_2] : memref<32x8xf32, #tpu.memory_space<vmem>>, vector<32x8xf32>
    %cst = arith.constant dense<0.000000e+00> : vector<32x128xf32>
    %2 = tpu.matmul %1, %0, %cst {dimension_numbers = #tpu.dot_dimension_numbers<[1], [0], [0], [1], [0, 0, 1, 1], [], []>} : vector<32x8xf32>, vector<8x128xf32>, vector<32x128xf32> -> vector<32x128xf32>
    %c0_3 = arith.constant 0 : index
    %c0_4 = arith.constant 0 : index
    %3 = vector.load %arg3[%c0_3, %c0_4] : memref<32x1xf32, #tpu.memory_space<vmem>>, vector<32x1xf32>
    %4 = vector.broadcast %3 : vector<32x1xf32> to vector<32x128xf32>
    %5 = arith.addf %2, %4 : vector<32x128xf32>
    %cst_5 = arith.constant 0.000000e+00 : f32
    %6 = vector.broadcast %cst_5 : f32 to vector<32x128xf32>
    %7 = arith.maximumf %5, %6 : vector<32x128xf32>
    %c0_6 = arith.constant 0 : index
    %c0_7 = arith.constant 0 : index
    %8 = vector.load %arg4[%c0_6, %c0_7] : memref<32x32xf32, #tpu.memory_space<vmem>>, vector<32x32xf32>
    %cst_8 = arith.constant dense<0.000000e+00> : vector<32x128xf32>
    %9 = tpu.matmul %8, %7, %cst_8 {dimension_numbers = #tpu.dot_dimension_numbers<[1], [0], [0], [1], [0, 0, 1, 1], [], []>} : vector<32x32xf32>, vector<32x128xf32>, vector<32x128xf32> -> vector<32x128xf32>
    %c0_9 = arith.constant 0 : index
    %c0_10 = arith.constant 0 : index
    %10 = vector.load %arg5[%c0_9, %c0_10] : memref<32x1xf32, #tpu.memory_space<vmem>>, vector<32x1xf32>
    %11 = vector.broadcast %10 : vector<32x1xf32> to vector<32x128xf32>
    %12 = arith.addf %9, %11 : vector<32x128xf32>
    %cst_11 = arith.constant 0.000000e+00 : f32
    %13 = vector.broadcast %cst_11 : f32 to vector<32x128xf32>
    %14 = arith.maximumf %12, %13 : vector<32x128xf32>
    %c0_12 = arith.constant 0 : index
    %c0_13 = arith.constant 0 : index
    %15 = vector.load %arg6[%c0_12, %c0_13] : memref<8x32xf32, #tpu.memory_space<vmem>>, vector<8x32xf32>
    %cst_14 = arith.constant dense<0.000000e+00> : vector<8x128xf32>
    %16 = tpu.matmul %15, %14, %cst_14 {dimension_numbers = #tpu.dot_dimension_numbers<[1], [0], [0], [1], [0, 0, 1, 1], [], []>} : vector<8x32xf32>, vector<32x128xf32>, vector<8x128xf32> -> vector<8x128xf32>
    %c0_15 = arith.constant 0 : index
    %c0_16 = arith.constant 0 : index
    %17 = vector.load %arg7[%c0_15, %c0_16] : memref<8x1xf32, #tpu.memory_space<vmem>>, vector<8x1xf32>
    %18 = vector.broadcast %17 : vector<8x1xf32> to vector<8x128xf32>
    %19 = arith.addf %16, %18 : vector<8x128xf32>
    %20 = math.tanh %19 : vector<8x128xf32>
    %c0_17 = arith.constant 0 : index
    %c0_18 = arith.constant 0 : index
    %21 = vector.load %arg8[%c0_17, %c0_18] : memref<8x128xf32, #tpu.memory_space<vmem>>, vector<8x128xf32>
    tpu.vector_store %arg8[%c0_17, %c0_18], %20 {strides = array<i32>} : memref<8x128xf32, #tpu.memory_space<vmem>>, vector<8x128xf32>,
    return
  }
  func.func @transform_0(%arg0: i32) -> (i32, i32) {
    %c0_i32 = arith.constant 0 : i32
    %c0_i32_0 = arith.constant 0 : i32
    return %c0_i32, %arg0 : i32, i32
  }
  func.func @transform_1(%arg0: i32) -> (i32, i32) {
    %c0_i32 = arith.constant 0 : i32
    %c0_i32_0 = arith.constant 0 : i32
    %c0_i32_1 = arith.constant 0 : i32
    return %c0_i32, %c0_i32_0 : i32, i32
  }
  func.func @transform_2(%arg0: i32) -> (i32, i32) {
    %c0_i32 = arith.constant 0 : i32
    %c0_i32_0 = arith.constant 0 : i32
    %c0_i32_1 = arith.constant 0 : i32
    return %c0_i32, %c0_i32_0 : i32, i32
  }
  func.func @transform_3(%arg0: i32) -> (i32, i32) {
    %c0_i32 = arith.constant 0 : i32
    %c0_i32_0 = arith.constant 0 : i32
    %c0_i32_1 = arith.constant 0 : i32
    return %c0_i32, %c0_i32_0 : i32, i32
  }
  func.func @transform_4(%arg0: i32) -> (i32, i32) {
    %c0_i32 = arith.constant 0 : i32
    %c0_i32_0 = arith.constant 0 : i32
    %c0_i32_1 = arith.constant 0 : i32
    return %c0_i32, %c0_i32_0 : i32, i32
  }
  func.func @transform_5(%arg0: i32) -> (i32, i32) {
    %c0_i32 = arith.constant 0 : i32
    %c0_i32_0 = arith.constant 0 : i32
    %c0_i32_1 = arith.constant 0 : i32
    return %c0_i32, %c0_i32_0 : i32, i32
  }
  func.func @transform_6(%arg0: i32) -> (i32, i32) {
    %c0_i32 = arith.constant 0 : i32
    %c0_i32_0 = arith.constant 0 : i32
    %c0_i32_1 = arith.constant 0 : i32
    return %c0_i32, %c0_i32_0 : i32, i32
  }
  func.func @transform_7(%arg0: i32) -> (i32, i32) {
    %c0_i32 = arith.constant 0 : i32
    %c0_i32_0 = arith.constant 0 : i32
    return %c0_i32, %arg0 : i32, i32
  }
}

</mosaic_0001>

<bundles_post_ra>
// kernel: tpu_custom_call.1
= control target key start
LH: loop header
LB: loop body
LE: loop exit
PB: predicated region body
PF: predicated region fallthrough
CT: control target
= control target key end

     0   :  { %vm56_vm0 = vcmask 64512   ;;  %v474_v5 = vmov 0   ;;  %s587_s0 = inlined_call_operand.vmem [shape: f32[8,128], index: 0, kind: input, shape index: {}]   ;;  %s588_s1 = inlined_call_operand.vmem [shape: f32[32,8], index: 1, kind: input, shape index: {}]   ;;  %s589_s2 = inlined_call_operand.vmem [shape: f32[32,1], index: 2, kind: input, shape index: {}]   ;;  %s590_s3 = inlined_call_operand.vmem [shape: f32[32,32], index: 3, kind: input, shape index: {}]   ;;  %s591_s4 = inlined_call_operand.vmem [shape: f32[32,1], index: 4, kind: input, shape index: {}]   ;;  %s592_s5 = inlined_call_operand.vmem [shape: f32[8,32], index: 5, kind: input, shape index: {}]   ;;  %s593_s6 = inlined_call_operand.vmem [shape: f32[8,1], index: 6, kind: input, shape index: {}]   ;;  %s594_s7 = inlined_call_operand.hbm [shape: f32[8,128], index: 7, kind: output, shape index: {}]  }
   0x1   :  { %v27_v0 = vld [vmem:[%s587_s0] sm:$0xff]  ;;  %v29_v2 = vld [vmem:[%s588_s1 + $0x8] sm:$0xff]  ;;  %v30_v3 = vld [vmem:[%s588_s1 + $0x10] sm:$0xff]  ;;  %448 = vset.pattern.permute.xlu0 %v474_v5  ;;  %449 = vset.pattern.permute.xlu1 %v474_v5 }
   0x2   :  { %v28_v1 = vld [vmem:[%s588_s1] sm:$0xff]  ;;  %411 = vmatprep.subr.mxu0 %v27_v0  ;;  %v35_v4 = vld [vmem:[%s589_s2 + $0x18] sm:$0xff]  ;;  %v33_v6 = vld [vmem:[%s589_s2 + $0x8] sm:$0xff] }
   0x3   :  { %413 = vmatprep.mubr.msk.f32.mxu0 %vm56_vm0, %v28_v1  ;;  %412 = vmatpush3.msra.mxu0 %v27_v0  ;;  %v31_v7 = vld [vmem:[%s588_s1 + $0x18] sm:$0xff]  ;;  %v34_v8 = vld [vmem:[%s589_s2 + $0x10] sm:$0xff] }
   0x4   :  { %414 = vmatmul.mubr.msk.f32.vlgmr.msra.gmra.mxu0 %vm56_vm0, %v29_v2  ;;  %53 = vperm.xlu0 %448, %v35_v4  }
   0x5   :  { %416 = vmatprep.mubr.msk.f32.mxu0 %vm56_vm0, %v30_v3 }
   0x6   :  { %12 = vsyncpa [#allocation3], 0  ;;  %43 = vperm.xlu1 %449, %v33_v6   ;;  %v32_v9 = vld [vmem:[%s589_s2] sm:$0xff]  ;;  %v165_v10 = vld [vmem:[%s591_s4 + $0x18] sm:$0xff]  ;;  %vm186_vm1 = vcmask 261120   ;;  %v475_v35 = vmov 0.0  }
   0x7   :  { %v164_v11 = vld [vmem:[%s591_s4 + $0x10] sm:$0xff]  ;;  %v163_v12 = vld [vmem:[%s591_s4 + $0x8] sm:$0xff]  ;;  %v162_v13 = vld [vmem:[%s591_s4] sm:$0xff]  ;;  %433 = vmatprep.subr.mxu0 %v475_v35  ;;  %vm476_vm2 = vmmov 0   ;;  %s477_s10 = smov [#allocation2]  }
   0x8   :  { %417 = vmatmul.mubr.msk.f32.gmra.mxu0 %vm56_vm0, %v31_v7  ;;  %48 = vperm.xlu0 %448, %v34_v8   ;;  %v289_v14 = vld [vmem:[%s593_s6] sm:$0xff]  ;;  %v159_v32 = vld [vmem:[%s590_s3 + $0x8] sm:$0xff]  ;;  %v160_v33 = vld [vmem:[%s590_s3 + $0x10] sm:$0xff]  ;;  %s376_s0 = sshll.u32 %s477_s10, 4  ;;  %s377_s0 = int_to_ptr.vmem [resolvable:$true] %s376_s0 }
   0x9   :  { %v158_v15 = vld [vmem:[%s590_s3] sm:$0xff]  ;;  %v161_v34 = vld [vmem:[%s590_s3 + $0x18] sm:$0xff]  ;;  %441 = vmatprep.mubr.msk.f32.mxu0 %vm476_vm2, %v475_v35  ;;  %s452_s11 = scalar_lea.vmem %s377_s0, 128  ;;  %p457_p1 = scmp.lt.s32.totalorder %s377_s0, %s377_s0 }
   0xa   :  { %38 = vperm.xlu1 %449, %v32_v9   ;;  %427 = vmatprep.mubr.msk.f32.mxu1 %vm186_vm1, %v158_v15  ;;  %v288_v52 = vld [vmem:[%s592_s5] sm:$0xff]  ;;  %p453_p0 = scmp.ne.s32.totalorder %s377_s0, %s452_s11  ;;  %p458_p2 = scmp.lt.s32.totalorder %s452_s11, %s452_s11 }
   0xc   :  { %183 = vperm.xlu0 %448, %v165_v10   ;;  %p459_p3 = por %p458_p2, %p457_p1 }
   0xe   :  { %178 = vperm.xlu1 %449, %v164_v11   ;;  %p460_p4 = pnand %p459_p3, %p453_p0 }
  0x10   :  { %173 = vperm.xlu0 %448, %v163_v12  }
  0x12   :  { %168 = vperm.xlu1 %449, %v162_v13  }
  0x14   :  { %292 = vperm.xlu0 %448, %v289_v14  }
  0x7f   :  { %v54_v16 = vpop.permute.xlu0 %53 }
  0x81   :  { %v44_v18 = vpop.permute.xlu1 %43 }
  0x83   :  { %v49_v22 = vpop.permute.xlu0 %48 }
  0x85   :  { %v39_v27 = vpop.permute.xlu1 %38 }
  0x87   :  { %v184_v36 = vpop.permute.xlu0 %183 }
  0x89   :  { %v179_v38 = vpop.permute.xlu1 %178 }
  0x8b   :  { %v174_v42 = vpop.permute.xlu0 %173 }
  0x8d   :  { %v169_v47 = vpop.permute.xlu1 %168 }
  0x8f   :  { %v293_v53 = vpop.permute.xlu0 %292 }
  0xc4   :  { %v415_v17 = vpop.f32.mrf.mxu0 }
  0xc5   :  { %v141_v24 = vadd.f32 %v415_v17, %v44_v18 }
  0xc6   :  { %v135_v19 = vpop.f32.mrf.mxu0 }
  0xc7   :  { %v136_v28 = vadd.f32 %v135_v19, %v39_v27  ;;  %v155_v30 = vmax.f32 %v141_v24, 0.0 }
  0xc8   :  { %v418_v20 = vpop.f32.mrf.mxu0 }
  0xc9   :  { %v151_v21 = vadd.f32 %v418_v20, %v54_v16  ;;  %v154_v31 = vmax.f32 %v136_v28, 0.0 }
  0xca   :  { %v145_v23 = vpop.f32.mrf.mxu0 }
  0xcb   :  { %v157_v25 = vmax.f32 %v151_v21, 0.0  ;;  %v146_v26 = vadd.f32 %v145_v23, %v49_v22 }
  0xcd   :  { %v156_v29 = vmax.f32 %v146_v26, 0.0  ;;  %419 = vmatprep.subr.mxu1 %v157_v25 }
  0xce   :  { %420 = vmatpush3.msra.mxu1 %v157_v25 }
  0xcf   :  { %421 = vmatprep.subr.mxu1 %v156_v29 }
  0xd0   :  { %422 = vmatpush3.msra.mxu1 %v156_v29 }
  0xd1   :  { %423 = vmatprep.subr.mxu1 %v155_v30 }
  0xd2   :  { %424 = vmatpush3.msra.mxu1 %v155_v30 }
  0xd3   :  { %425 = vmatprep.subr.mxu1 %v154_v31 }
  0xd4   :  { %426 = vmatpush3.msra.mxu1 %v154_v31 }
  0xd5   :  { %428 = vmatmul.mubr.msk.f32.vlgmr.msra.gmra.mxu1 %vm186_vm1, %v159_v32 }
  0xd6   :  { %430 = vmatprep.mubr.msk.f32.mxu1 %vm186_vm1, %v160_v33 }
  0xd9   :  { %431 = vmatmul.mubr.msk.f32.gmra.mxu1 %vm186_vm1, %v161_v34 }
 0x195   :  { %v429_v37 = vpop.f32.mrf.mxu1 }
 0x196   :  { %v271_v44 = vadd.f32 %v429_v37, %v174_v42 }
 0x197   :  { %v265_v39 = vpop.f32.mrf.mxu1 }
 0x198   :  { %v266_v48 = vadd.f32 %v265_v39, %v169_v47  ;;  %v285_v50 = vmax.f32 %v271_v44, 0.0 }
 0x199   :  { %v432_v40 = vpop.f32.mrf.mxu1 }
 0x19a   :  { %v281_v41 = vadd.f32 %v432_v40, %v184_v36  ;;  %v284_v51 = vmax.f32 %v266_v48, 0.0 }
 0x19b   :  { %v275_v43 = vpop.f32.mrf.mxu1 }
 0x19c   :  { %v287_v45 = vmax.f32 %v281_v41, 0.0  ;;  %v276_v46 = vadd.f32 %v275_v43, %v179_v38 }
 0x19e   :  { %v286_v49 = vmax.f32 %v276_v46, 0.0  ;;  %434 = vmatpush3.msra.mxu0 %v287_v45 }
 0x19f   :  { %435 = vmatprep.subr.mxu0 %v475_v35 }
 0x1a0   :  { %436 = vmatpush3.msra.mxu0 %v286_v49 }
 0x1a1   :  { %437 = vmatprep.subr.mxu0 %v475_v35 }
 0x1a2   :  { %438 = vmatpush3.msra.mxu0 %v285_v50 }
 0x1a3   :  { %439 = vmatprep.subr.mxu0 %v475_v35 }
 0x1a4   :  { %440 = vmatpush3.msra.mxu0 %v284_v51 }
 0x1a5   :  { %442 = vmatmul.mubr.msk.f32.vlgmr.msra.gmra.mxu0 %vm186_vm1, %v288_v52 }
 0x265   :  { %v364_v54 = vpop.f32.mrf.mxu0 }
 0x266   :  { %v365_v55 = vadd.f32 %v364_v54, %v293_v53 }
 0x267   :  { %v443_v56 = vpop.f32.mrf.mxu0 }
 0x268   :  { %450 = vtanh.f32 %v365_v55 }
 0x275   :  { %v451_v57 = vpop.eup %450 }
 0x276   :  { %369 = vst [vmem:[#allocation2] sm:$0xff] %v451_v57 }
 0x277   :  { %463 = shalt.err (!%p460_p4)
}
 0x278   :  { %379 = dma.vmem_to_hbm [thread:$0]  %s377_s0, 128, %s594_s7, [#allocation3]  }
 0x279   :  { %472 = dma.done.wait [#allocation3], 128  }
 0x27a   :  { %473 = vsyncadd [#allocation3], 4294967168 }
 0x27b   :  { %383 = vsyncpa [#allocation3], 1 }

</bundles_post_ra>
